<compile_context>
chip_gen: v6e
topology: v6e:2x2x1
jax: 0.10.0
libtpu: 0.0.40
codegen_flags: <defaults>
</compile_context>

<pallas_src>
import functools

import jax
import jax.numpy as jnp
from jax.experimental import pallas as pl
from jax.experimental.pallas import tpu as pltpu

_LANE = 128
_SUBLANE = 8


def _round_up(x, m):
    return (x + m - 1) // m * m


def _padded_tile_bytes(rows, cols, itemsize):
    """VMEM footprint of a 2-D tile after (8, 128) layout padding."""
    return _round_up(max(rows, 1), _SUBLANE) * _round_up(max(cols, 1), _LANE) * itemsize


def _compute_dtype():
    """bf16 on chips with a bf16 VALU (v6e / v7x); f32 otherwise (v5e & older)."""
    try:
        kind = jax.devices()[0].device_kind.lower()
    except Exception:
        return jnp.float32
    if ("v6" in kind) or ("v7" in kind) or ("7x" in kind):
        return jnp.bfloat16
    return jnp.float32


def _multihot_scale_kernel(ids_ref, w_ref, b_ref, out_ref, *, tile_v):
    # ids_ref : (tile_n, M)   int32
    # w_ref   : (tile_v, E)   f32 (v5e) / bf16 (v6e, v7x); global row 0 zeroed
    # b_ref   : (1, E)        float32
    # out_ref : (tile_n, E)   float32 — resident across the V (reduction) axis,
    #                          so it doubles as the accumulator (no scratch).
    k = pl.program_id(1)

    @pl.when(k == 0)
    def _():
        out_ref[...] = jnp.broadcast_to(b_ref[...], out_ref.shape)

    ids = ids_ref[...]                                    # (tile_n, M)
    _, m = ids.shape

    # Vocab ids covered by this weight block: [k*tile_v, (k+1)*tile_v).
    col = jax.lax.broadcasted_iota(jnp.int32, (1, tile_v), 1) + k * tile_v

    # Multi-hot counts as a single fused chain of M pure-VPU 2-D compares
    # (no 3-D intermediate, no zeros init); counts <= M are exact in bf16.
    cdt = w_ref.dtype
    mh = functools.reduce(
        jnp.add, [(ids[:, j:j + 1] == col).astype(cdt) for j in range(m)]
    )

    # Partial linear layer on the MXU; f32 accumulation into the resident block.
    out_ref[...] += jnp.dot(mh, w_ref[...], preferred_element_type=jnp.float32)


def multihot_n_scale(content_input, weight, bias, *, tile_n=512, tile_v=None):
    """content_input: [B, S, M] ints, weight: [E, V], bias: [E] -> [B, S, E] f32."""
    B, S, M = content_input.shape
    E, V = weight.shape
    N = B * S

    cdt = _compute_dtype()
    cdt_bytes = jnp.dtype(cdt).itemsize

    # --- tile sizing --------------------------------------------------------
    # tile_n: sublane-granular and capped so the parallel N axis has >= 2 steps
    # (shards across both TensorCores on v7x; ~free elsewhere).
    tile_n = max(_SUBLANE, min(tile_n, _round_up((N + 1) // 2, _SUBLANE)))
    N_pad = _round_up(N, tile_n)

    # tile_v: lane-granular vocab blocks. Small vocab -> whole weight resident,
    # single reduction step; otherwise stream 256-wide blocks (keeps the live
    # (tile_n, tile_v) compare intermediate modest).
    V_lane = _round_up(V, _LANE)
    if tile_v is None:
        tile_v = V_lane if V_lane <= 1024 else 256
    tile_v = _round_up(min(tile_v, V_lane), _LANE)
    V_pad = _round_up(V, tile_v)

    # --- operand prep (one-time trace-level ops) ----------------------------
    ids_flat = content_input.reshape(N, M).astype(jnp.int32)
    if N_pad > N:
        # Pad rows use id 0, whose weight row is zeroed; sliced away below.
        ids_flat = jnp.pad(ids_flat, ((0, N_pad - N), (0, 0)))
    # TODO(synk): if the ids DMA shows up exposed (small V, large N), repack
    # ids lane-dense (e.g. (M, N) layout) — the (N, M) tile's minor dim pads
    # to 128 lanes in HBM/VMEM.

    w_t = weight.T.astype(jnp.float32)                    # (V, E)
    w_t = w_t.at[0].set(0.0)                              # == multi_hot[:, :, 0] = 0
    if V_pad > V:
        w_t = jnp.pad(w_t, ((0, V_pad - V), (0, 0)))      # in-range ids never hit these
    w_t = w_t.astype(cdt)
    b2 = bias.reshape(1, E).astype(jnp.float32)

    # --- explicit VMEM budget (layout-padded, v7x-safe cap) -------------------
    vmem_needed = (
        2 * _padded_tile_bytes(tile_n, M, 4)              # ids tiles (double-buffered)
        + 2 * _padded_tile_bytes(tile_v, E, cdt_bytes)    # weight blocks (double-buffered)
        + _padded_tile_bytes(1, E, 4)                     # bias
        + 2 * _padded_tile_bytes(tile_n, E, 4)            # resident output tiles
        + 3 * _padded_tile_bytes(tile_n, tile_v, cdt_bytes)  # mh + compare temporaries
    )
    # Stay below v7x's 64 MiB physical VMEM (v5e/v6e have 128 MiB).
    vmem_limit = int(min(max(2 * vmem_needed, 32 * 1024 * 1024),
                         56 * 1024 * 1024))

    kernel = functools.partial(_multihot_scale_kernel, tile_v=tile_v)

    out_flat = pl.pallas_call(
        kernel,
        out_shape=jax.ShapeDtypeStruct((N_pad, E), jnp.float32),
        grid_spec=pltpu.PrefetchScalarGridSpec(
            num_scalar_prefetch=0,
            grid=(N_pad // tile_n, V_pad // tile_v),      # reduction (V) axis last
            in_specs=[
                pl.BlockSpec((tile_n, M), lambda i, k: (i, 0)),   # ids tile
                pl.BlockSpec((tile_v, E), lambda i, k: (k, 0)),   # streamed weight
                pl.BlockSpec((1, E), lambda i, k: (0, 0)),        # bias
            ],
            out_specs=pl.BlockSpec((tile_n, E), lambda i, k: (i, 0)),
        ),
        compiler_params=pltpu.CompilerParams(
            dimension_semantics=("parallel", "arbitrary"),
            vmem_limit_bytes=vmem_limit,
        ),
    )(ids_flat, w_t, b2)

    return out_flat[:N].reshape(B, S, E)


def _reference(content_input, weight, bias):
    """Pure-JAX f32 reference mirroring the PyTorch forward."""
    V = weight.shape[1]
    one_hot = jax.nn.one_hot(content_input, V, dtype=jnp.float32)  # (B,S,M,V)
    mh = one_hot.sum(axis=2)                                       # (B,S,V)
    mh = mh.at[:, :, 0].set(0.0)
    return mh @ weight.T + bias


if __name__ == "__main__":
    B, S, M = 2, 8, 4          # batch, sequence, multi-hot items per position
    V, E = 128, 32             # vocab_size, embed_size

    key = jax.random.PRNGKey(0)
    k_ids, k_w, k_b = jax.random.split(key, 3)

    content_input = jax.random.randint(k_ids, (B, S, M), 0, V, dtype=jnp.int32)

    # Deterministic Linear(vocab_size, embed_size) init (PyTorch-style uniform).
    bound = 1.0 / jnp.sqrt(jnp.float32(V))
    weight = jax.random.uniform(k_w, (E, V), jnp.float32, -bound, bound)
    bias = jax.random.uniform(k_b, (E,), jnp.float32, -bound, bound)

    out = multihot_n_scale(content_input, weight, bias)
    out = jax.block_until_ready(out)

    ref = _reference(content_input, weight, bias)
    assert out.shape == (B, S, E)
    # bf16 weight on v6e/v7x MXU path -> slightly looser tolerance than pure f32.
    assert jnp.allclose(out, ref, atol=1e-2, rtol=1e-2), "mismatch vs reference"

    print("KERNEL_OK")
</pallas_src>

<mosaic_0001>
module attributes {stable_mosaic.version = 11 : i64} {
  func.func @_multihot_scale_kernel(%arg0: i32, %arg1: i32, %arg2: memref<8x4xi32, #tpu.memory_space<vmem>>, %arg3: memref<128x32xf32, #tpu.memory_space<vmem>>, %arg4: memref<1x32xf32, #tpu.memory_space<vmem>>, %arg5: memref<8x32xf32, #tpu.memory_space<vmem>>) attributes {dimension_semantics = [#tpu.dimension_semantics<parallel>, #tpu.dimension_semantics<arbitrary>], iteration_bounds = array<i64: 2, 1>, scalar_prefetch = 0 : i64, scratch_operands = 0 : i64, tpu.core_type = #tpu.core_type<tc>, window_params = [{transform_indices = @transform_0, window_bounds = array<i64: 8, 4>}, {transform_indices = @transform_1, window_bounds = array<i64: 128, 32>}, {pipeline_mode = #tpu.pipeline_mode<synchronous>, transform_indices = @transform_2, window_bounds = array<i64: 1, 32>}, {transform_indices = @transform_3, window_bounds = array<i64: 8, 32>}]} {
    %c0_i32 = arith.constant 0 : i32
    %0 = arith.cmpi eq, %arg1, %c0_i32 : i32
    %1 = arith.extui %0 : i1 to i32
    %c0_i32_0 = arith.constant 0 : i32
    %2 = arith.cmpi ne, %1, %c0_i32_0 : i32
    scf.if %2 {
      %c0_8 = arith.constant 0 : index
      %c0_9 = arith.constant 0 : index
      %40 = vector.load %arg4[%c0_8, %c0_9] : memref<1x32xf32, #tpu.memory_space<vmem>>, vector<1x32xf32>
      %41 = vector.shape_cast %40 : vector<1x32xf32> to vector<1x32xf32>
      %42 = vector.broadcast %41 : vector<1x32xf32> to vector<8x32xf32>
      %c0_10 = arith.constant 0 : index
      %c0_11 = arith.constant 0 : index
      %43 = vector.load %arg5[%c0_10, %c0_11] : memref<8x32xf32, #tpu.memory_space<vmem>>, vector<8x32xf32>
      tpu.vector_store %arg5[%c0_10, %c0_11], %42 {strides = array<i32>} : memref<8x32xf32, #tpu.memory_space<vmem>>, vector<8x32xf32>,
    } else {
    }
    %c0 = arith.constant 0 : index
    %c0_1 = arith.constant 0 : index
    %3 = vector.load %arg2[%c0, %c0_1] : memref<8x4xi32, #tpu.memory_space<vmem>>, vector<8x4xi32>
    %4 = tpu.iota {dimensions = array<i32: 1>} : vector<1x128xi32>
    %c128_i32 = arith.constant 128 : i32
    %5 = arith.muli %arg1, %c128_i32 : i32
    %6 = vector.broadcast %5 : i32 to vector<1x128xi32>
    %7 = arith.addi %4, %6 : vector<1x128xi32>
    %8 = vector.extract_strided_slice %3 {offsets = [0, 0], sizes = [8, 1], strides = [1, 1]} : vector<8x4xi32> to vector<8x1xi32>
    %9 = vector.broadcast %8 : vector<8x1xi32> to vector<8x128xi32>
    %10 = vector.broadcast %7 : vector<1x128xi32> to vector<8x128xi32>
    %11 = arith.cmpi eq, %9, %10 : vector<8x128xi32>
    %12 = arith.extui %11 : vector<8x128xi1> to vector<8x128xi32>
    %13 = arith.sitofp %12 : vector<8x128xi32> to vector<8x128xf32>
    %14 = vector.extract_strided_slice %3 {offsets = [0, 1], sizes = [8, 1], strides = [1, 1]} : vector<8x4xi32> to vector<8x1xi32>
    %15 = vector.broadcast %14 : vector<8x1xi32> to vector<8x128xi32>
    %16 = vector.broadcast %7 : vector<1x128xi32> to vector<8x128xi32>
    %17 = arith.cmpi eq, %15, %16 : vector<8x128xi32>
    %18 = arith.extui %17 : vector<8x128xi1> to vector<8x128xi32>
    %19 = arith.sitofp %18 : vector<8x128xi32> to vector<8x128xf32>
    %20 = vector.extract_strided_slice %3 {offsets = [0, 2], sizes = [8, 1], strides = [1, 1]} : vector<8x4xi32> to vector<8x1xi32>
    %21 = vector.broadcast %20 : vector<8x1xi32> to vector<8x128xi32>
    %22 = vector.broadcast %7 : vector<1x128xi32> to vector<8x128xi32>
    %23 = arith.cmpi eq, %21, %22 : vector<8x128xi32>
    %24 = arith.extui %23 : vector<8x128xi1> to vector<8x128xi32>
    %25 = arith.sitofp %24 : vector<8x128xi32> to vector<8x128xf32>
    %26 = vector.extract_strided_slice %3 {offsets = [0, 3], sizes = [8, 1], strides = [1, 1]} : vector<8x4xi32> to vector<8x1xi32>
    %27 = vector.broadcast %26 : vector<8x1xi32> to vector<8x128xi32>
    %28 = vector.broadcast %7 : vector<1x128xi32> to vector<8x128xi32>
    %29 = arith.cmpi eq, %27, %28 : vector<8x128xi32>
    %30 = arith.extui %29 : vector<8x128xi1> to vector<8x128xi32>
    %31 = arith.sitofp %30 : vector<8x128xi32> to vector<8x128xf32>
    %32 = arith.addf %13, %19 : vector<8x128xf32>
    %33 = arith.addf %32, %25 : vector<8x128xf32>
    %34 = arith.addf %33, %31 : vector<8x128xf32>
    %c0_2 = arith.constant 0 : index
    %c0_3 = arith.constant 0 : index
    %35 = vector.load %arg5[%c0_2, %c0_3] : memref<8x32xf32, #tpu.memory_space<vmem>>, vector<8x32xf32>
    %c0_4 = arith.constant 0 : index
    %c0_5 = arith.constant 0 : index
    %36 = vector.load %arg3[%c0_4, %c0_5] : memref<128x32xf32, #tpu.memory_space<vmem>>, vector<128x32xf32>
    %cst = arith.constant dense<0.000000e+00> : vector<8x32xf32>
    %37 = tpu.matmul %34, %36, %cst {dimension_numbers = #tpu.dot_dimension_numbers<[1], [0], [0], [1], [0, 0, 1, 1], [], []>} : vector<8x128xf32>, vector<128x32xf32>, vector<8x32xf32> -> vector<8x32xf32>
    %38 = arith.addf %35, %37 : vector<8x32xf32>
    %c0_6 = arith.constant 0 : index
    %c0_7 = arith.constant 0 : index
    %39 = vector.load %arg5[%c0_6, %c0_7] : memref<8x32xf32, #tpu.memory_space<vmem>>, vector<8x32xf32>
    tpu.vector_store %arg5[%c0_6, %c0_7], %38 {strides = array<i32>} : memref<8x32xf32, #tpu.memory_space<vmem>>, vector<8x32xf32>,
    return
  }
  func.func @transform_0(%arg0: i32, %arg1: i32) -> (i32, i32) {
    %c0_i32 = arith.constant 0 : i32
    %c0_i32_0 = arith.constant 0 : i32
    return %arg0, %c0_i32 : i32, i32
  }
  func.func @transform_1(%arg0: i32, %arg1: i32) -> (i32, i32) {
    %c0_i32 = arith.constant 0 : i32
    %c0_i32_0 = arith.constant 0 : i32
    return %arg1, %c0_i32 : i32, i32
  }
  func.func @transform_2(%arg0: i32, %arg1: i32) -> (i32, i32) {
    %c0_i32 = arith.constant 0 : i32
    %c0_i32_0 = arith.constant 0 : i32
    %c0_i32_1 = arith.constant 0 : i32
    return %c0_i32, %c0_i32_0 : i32, i32
  }
  func.func @transform_3(%arg0: i32, %arg1: i32) -> (i32, i32) {
    %c0_i32 = arith.constant 0 : i32
    %c0_i32_0 = arith.constant 0 : i32
    return %arg0, %c0_i32 : i32, i32
  }
}

</mosaic_0001>

<bundles_post_ra>
// kernel: tpu_custom_call.1
= control target key start
LH: loop header
LB: loop body
LE: loop exit
PB: predicated region body
PF: predicated region fallthrough
CT: control target
= control target key end

     0   :  { %8 = vsyncpa [#allocation3], 0  ;;  %s861_s0 = inlined_call_operand.vmem [shape: s32[16,4], index: 0, kind: input, shape index: {}]   ;;  %s862_s1 = inlined_call_operand.vmem [shape: f32[128,32], index: 1, kind: input, shape index: {}]   ;;  %s863_s2 = inlined_call_operand.vmem [shape: f32[1,32], index: 2, kind: input, shape index: {}]   ;;  %s864_s3 = inlined_call_operand.hbm [shape: f32[16,32], index: 3, kind: output, shape index: {}]  }
   0x1   :  { %10 = vsyncpa [#allocation3 + $0x1], 0  ;;  %s672_s12 = smov 0   ;;  %s674_s13 = smov 0  }
   0x2   :  { %s676_s14 = smov 0   ;;  %s678_s15 = smov 0  }
   0x3   :  { %s680_s16 = smov 0   ;;  %s682_s17 = smov 0  }
   0x4 LB: > { %s432_s18 = sadd.s32 4294967295, %s643_s17   ;;  %s433_s19 = sadd.s32 4294967294, %s643_s17   ;;  %s643_s17 = sphi %s682_s17, %s16_s17   ;;  %s639_s16 = sphi %s680_s16, %s871_s16   ;;  %s635_s15 = sphi %s678_s15, %s870_s15   ;;  %s631_s14 = sphi %s676_s14, %s869_s14   ;;  %s627_s13 = sphi %s674_s13, %s868_s13   ;;  %s623_s12 = sphi %s672_s12, %s867_s12  }
   0x5   : > { %s28_s20 = sadd.s32 1, %s639_s16  ;;  %s108_s21 = sadd.s32 1, %s631_s14 }
   0x6   : > { %p30_p0 = scmp.ge.s32.totalorder %s28_s20, 2  ;;  %p118_p1 = scmp.ne.s32.totalorder %s631_s14, %s627_s13 }
   0x7   : > { %p119_p2 = scmp.eq.s32.totalorder %s432_s18, 1  ;;  %p124_p3 = scmp.ne.s32.totalorder %s627_s13, %s623_s12 }
   0x8   : > { %s873_s20 = smov (%p30_p0, %s28_s20), 0  ;;  %p125_p5 = scmp.eq.s32.totalorder %s433_s19, 1 }
   0x9   : > { %p712_p4 = por %p119_p2, %p118_p1  ;;  %s105_s23 = ssub.s32 %s639_s16, %s873_s20 }
   0xa   : > { %p437_p6 = scmp.ge.s32.totalorder %s643_s17, 1  ;;  %p106_p7 = scmp.eq.s32.totalorder %s105_s23, 0 }
   0xb   : > { %p719_p8 = por %p125_p5, %p124_p3  ;;  %p162_p9 = scmp.lt.s32.totalorder %s643_s17, 3 }
   0xc   : > { %s725_s25 = scalar_select %p106_p7, %s631_s14, %s108_s21  }
   0xd   : > { %p163_p10 = pnand %p437_p6, %p162_p9 }
   0xe   : > { %p190_p11 = scmp.lt.s32.totalorder (!%p163_p10), %s635_s15, 1  ;;  %s446_s8 = sshll.u32 (!%p163_p10), %s635_s15, 7 }
   0xf   : > { %166 = sbr.rel (%p163_p10) target bundleno = 370 (0x172), region = 32  ;;  %s817_s19 = scalar_lea.hbm (!%p163_p10), %s864_s3, %s446_s8 }
  0x14   : > { %v262_v0 = vld [vmem:[%s862_s1 + $0x78] sm:$0xff]  ;;  %v645_v1 = vmov 0   ;;  %v646_v2 = vmov 2   ;;  %s191_s28 = scalar_select %p190_p11, %s635_s15, 1  ;;  %v647_v3 = vmov 0.0   ;;  %v261_v4 = vld [vmem:[%s862_s1 + $0x70] sm:$0xff]  ;;  %v214_v23 = vlaneseq }
  0x15   : > { %562 = vset.pattern.permute.xlu0 %v645_v1  ;;  %564 = vset.pattern.permute.xlu1 %v646_v2  ;;  %v260_v5 = vld [vmem:[%s862_s1 + $0x68] sm:$0xff]  ;;  %v259_v7 = vld [vmem:[%s862_s1 + $0x60] sm:$0xff]  ;;  %v648_v8 = vmov 1   ;;  %v649_v9 = vmov 3   ;;  %v258_v10 = vld [vmem:[%s862_s1 + $0x58] sm:$0xff]  ;;  %vm650_vm0 = vmmov 0  }
  0x16   : > { %466 = vmatprep.subr.mxu0 %v647_v3  ;;  %s439_s4 = sshll.u32 %s191_s28, 3  ;;  %v257_v11 = vld [vmem:[%s862_s1 + $0x50] sm:$0xff]  ;;  %v256_v12 = vld [vmem:[%s862_s1 + $0x48] sm:$0xff]  ;;  %498 = vmatprep.mubr.msk.f32.mxu0 %vm650_vm0, %v647_v3  ;;  %s187_s28 = sand.u32 1, %s627_s13   ;;  %v440_v13 = vld [vmem:[%s863_s2] ss:$0 sm:$0xff] }
  0x17   : > { %467 = vmatpush3.msra.mxu0 %v262_v0  ;;  %s193_s7 = scalar_lea.vmem %s861_s0, %s439_s4  ;;  %vm211_vm1 = vcmask 261120   ;;  %v255_v14 = vld [vmem:[%s862_s1 + $0x40] sm:$0xff]  ;;  %s438_s6 = sshll.u32 %s187_s28, 3  ;;  %v254_v15 = vld [vmem:[%s862_s1 + $0x38] sm:$0xff]  ;;  %v253_v16 = vld [vmem:[%s862_s1 + $0x30] sm:$0xff]  ;;  %v215_v24 = vand.u32 127, %v214_v23 }
  0x18   : > { %468 = vmatprep.subr.mxu0 %v647_v3  ;;  %v213_v6 = vld [vmem:[%s193_s7] sm:$0xff]  ;;  %s774_s9 = scalar_lea.vmem [#allocation2], %s438_s6  ;;  %v252_v17 = vld [vmem:[%s862_s1 + $0x28] sm:$0xff]  ;;  %v250_v19 = vld [vmem:[%s862_s1 + $0x18] sm:$0xff]  ;;  %s337_s21 = scalar_lea.sflag [#allocation3], %s187_s28 }
  0x19   : > { %469 = vmatpush3.msra.mxu0 %v261_v4  ;;  %220 = vperm.xlu0 %562, %v213_v6   ;;  %212 = vst.msk [vmem:[%s774_s9] sm:$0xff] %vm211_vm1, %v440_v13  ;;  %v251_v18 = vld [vmem:[%s862_s1 + $0x20] sm:$0xff]  ;;  %v249_v20 = vld [vmem:[%s862_s1 + $0x10] sm:$0xff]  ;;  %v248_v21 = vld [vmem:[%s862_s1 + $0x8] sm:$0xff]  ;;  %s350_s10 = sshll.u32 %s774_s9, 4  ;;  %s651_s15 = smov [#allocation2]   ;;  %s351_s10 = int_to_ptr.vmem [resolvable:$true] %s350_s10 }
  0x1a   : > { %470 = vmatprep.subr.mxu0 %v647_v3  ;;  %232 = vperm.xlu1 %564, %v213_v6   ;;  %v247_v22 = vld [vmem:[%s862_s1] sm:$0xff]  ;;  %s567_s23 = scalar_lea.vmem %s351_s10, 128  ;;  %s571_s26 = sshll.u32 %s651_s15, 4  ;;  %s572_s26 = int_to_ptr.vmem [resolvable:$false] %s571_s26 }
  0x1b   : > { %471 = vmatpush3.msra.mxu0 %v260_v5  ;;  %p568_p12 = scmp.ne.s32.totalorder %s351_s10, %s567_s23  ;;  %s573_s27 = scalar_lea.vmem %s572_s26, 256 }
  0x1c   : > { %472 = vmatprep.subr.mxu0 %v647_v3  ;;  %p574_p1 = scmp.lt.s32.totalorder %s351_s10, %s572_s26  ;;  %p575_p2 = scmp.lt.s32.totalorder %s573_s27, %s567_s23 }
  0x1d   : > { %473 = vmatpush3.msra.mxu0 %v259_v7  ;;  %563 = vset.pattern.permute.xlu0 %v648_v8  ;;  %p569_p13 = pnand %p568_p12, %p712_p4 }
  0x1e   : > { %565 = vset.pattern.permute.xlu1 %v649_v9  ;;  %226 = vperm.xlu0 %563, %v213_v6   ;;  %p576_p3 = por %p575_p2, %p574_p1 }
  0x1f   : > { %238 = vperm.xlu1 %565, %v213_v6   ;;  %474 = vmatprep.subr.mxu0 %v647_v3  ;;  %p570_p0 = pneg %p569_p13 }
  0x20   : > { %475 = vmatpush3.msra.mxu0 %v258_v10  ;;  %v246_v36 = vld [vmem:[%s774_s9] sm:$0xff] }
  0x21   : > { %476 = vmatprep.subr.mxu0 %v647_v3  ;;  %p577_p5 = pnand %p576_p3, %p570_p0 }
  0x22   : > { %477 = vmatpush3.msra.mxu0 %v257_v11  ;;  %566 = vset.pattern.permute.xlu0 %v649_v9 }
  0x23   : > { %478 = vmatprep.subr.mxu0 %v647_v3 }
  0x24   : > { %479 = vmatpush3.msra.mxu0 %v256_v12 }
  0x25   : > { %480 = vmatprep.subr.mxu0 %v647_v3 }
  0x26   : > { %481 = vmatpush3.msra.mxu0 %v255_v14 }
  0x27   : > { %482 = vmatprep.subr.mxu0 %v647_v3 }
  0x28   : > { %483 = vmatpush3.msra.mxu0 %v254_v15 }
  0x29   : > { %484 = vmatprep.subr.mxu0 %v647_v3 }
  0x2a   : > { %485 = vmatpush3.msra.mxu0 %v253_v16 }
  0x2b   : > { %486 = vmatprep.subr.mxu0 %v647_v3 }
  0x2c   : > { %487 = vmatpush3.msra.mxu0 %v252_v17 }
  0x2d   : > { %488 = vmatprep.subr.mxu0 %v647_v3 }
  0x2e   : > { %489 = vmatpush3.msra.mxu0 %v251_v18 }
  0x2f   : > { %490 = vmatprep.subr.mxu0 %v647_v3 }
  0x30   : > { %491 = vmatpush3.msra.mxu0 %v250_v19 }
  0x31   : > { %492 = vmatprep.subr.mxu0 %v647_v3 }
  0x32   : > { %493 = vmatpush3.msra.mxu0 %v249_v20 }
  0x33   : > { %494 = vmatprep.subr.mxu0 %v647_v3 }
  0x34   : > { %495 = vmatpush3.msra.mxu0 %v248_v21 }
  0x35   : > { %496 = vmatprep.subr.mxu0 %v647_v3 }
  0x36   : > { %497 = vmatpush3.msra.mxu0 %v247_v22 }
  0x94   : > { %v221_v25 = vpop.permute.xlu0 %220 }
  0x95   : > { %v233_v26 = vpop.permute.xlu1 %232  ;;  %vm222_vm2 = vcmp.eq.s32.totalorder %v221_v25, %v215_v24 }
  0x96   : > { %vm234_vm3 = vcmp.eq.s32.totalorder %v233_v26, %v215_v24  ;;  %v441_v29 = vsel %vm222_vm2, 1.0, %v647_v3 }
  0x97   : > { %v443_v32 = vsel %vm234_vm3, 1.0, %v647_v3 }
  0x99   : > { %v227_v27 = vpop.permute.xlu0 %226 }
  0x9a   : > { %v239_v28 = vpop.permute.xlu1 %238  ;;  %vm228_vm4 = vcmp.eq.s32.totalorder %v227_v27, %v215_v24 }
  0x9b   : > { %vm240_vm5 = vcmp.eq.s32.totalorder %v239_v28, %v215_v24  ;;  %v442_v30 = vsel %vm228_vm4, 1.0, %v647_v3 }
  0x9c   : > { %v243_v31 = vadd.f32 %v442_v30, %v441_v29  ;;  %v444_v33 = vsel %vm240_vm5, 1.0, %v647_v3 }
  0x9e   : > { %v244_v34 = vadd.f32 %v443_v32, %v243_v31 }
  0xa0   : > { %v245_v35 = vadd.f32 %v444_v33, %v244_v34 }
  0xa2   : > { %499 = vmatmul.mubr.f32.vlgmr.msra.gmra.mxu0 %v245_v35 }
 0x162   : > { %v329_v37 = vpop.f32.mrf.mxu0 }
 0x163   : > { %v333_v38 = vadd.f32 %v329_v37, %v246_v36 }
 0x164   : > { %v500_v39 = vpop.f32.mrf.mxu0 }
 0x165   : > { %335 = vst.msk [vmem:[%s774_s9] sm:$0xff] %vm211_vm1, %v333_v38 }
 0x166   : > { %580 = shalt.err (!%p577_p5)
}
 0x167   : > { %s581_s9 = scalar_lea.hbm %s817_s19, 128  ;;  %s585_s30 = scalar_lea.hbm %s864_s3, 256 }
 0x168   : > { %p582_p6 = scmp.ne.s32.totalorder %s817_s19, %s581_s9  ;;  %p586_p10 = scmp.lt.s32.totalorder %s817_s19, %s864_s3 }
 0x169   : > { %p587_p11 = scmp.lt.s32.totalorder %s585_s30, %s581_s9 }
 0x16a   : > { %p583_p7 = pnand %p582_p6, %p712_p4 }
 0x16b   : > { %p588_p12 = por %p587_p11, %p586_p10 }
 0x16c   : > { %p584_p9 = pneg %p583_p7 }
 0x16e   : > { %p589_p13 = pnand %p588_p12, %p584_p9 }
 0x170   : > { %592 = shalt.err (!%p589_p13)
}
 0x171   : > { %501 = dma.vmem_to_hbm [thread:$0]  (%p712_p4), %s351_s10, 128, %s817_s19, %s337_s21  }
 0x172 PF: > { %p507_p0 = scmp.ge.s32.totalorder %s643_s17, 2  ;;  %s362_s6 = sand.u32 1, %s623_s12  }
 0x173   : > { %s363_s7 = scalar_lea.sflag [#allocation3], %s362_s6 }
 0x174   : > { %p504_p1 = pnand %p507_p0, %p719_p8 }
 0x176   : > { %p505_p2 = pneg %p504_p1 }
 0x178   : > { %618 = dma.done.wait (%p505_p2), %s363_s7, 128  }
 0x179   : > { %620 = vsyncadd (%p505_p2), %s363_s7, 4294967168  ;;  %s16_s17 = sadd.s32 1, %s643_s17   ;;  %s867_s12 = smov %s627_s13 }
 0x17a   : > { %p13_p3 = scmp.ge.s32.totalorder %s16_s17, 4   ;;  %s868_s13 = smov %s631_s14 }
 0x17b   : > { %s869_s14 = smov %s725_s25  ;;  %s870_s15 = smov %s639_s16 }
 0x17c   : > { %s871_s16 = smov %s873_s20  ;;  %15 = sbr.rel (!%p13_p3) target bundleno = 4 (0x4), region = 74 }
 0x181   :  { %368 = vsyncpa [#allocation3], 1 }
 0x182   :  { %370 = vsyncpa [#allocation3 + $0x1], 1 }

</bundles_post_ra>
